<compile_context>
chip_gen: v6e
topology: v6e:2x2x1
jax: 0.10.0
libtpu: 0.0.40
codegen_flags: <defaults>
</compile_context>

<pallas_src>
from functools import partial

import jax
import jax.numpy as jnp
from jax import lax
from jax.experimental import pallas as pl
from jax.experimental.pallas import tpu as pltpu

_MXU_DTYPE = jnp.bfloat16        # MXU operand dtype (f32 accumulation everywhere)
_ACT_DTYPE = jnp.bfloat16        # weights + inter-kernel activations in HBM

# Projection tiles: full-K blocks (K = C <= 1280 always fits), tm=1024 keeps
# weight re-streaming to <= M/1024 passes, tn=256 matches the 256-wide MXU.
_TM, _TN = 1024, 256
# Attention tiles: tq=128 keeps a multi-block 'parallel' q axis for v7x's two
# TensorCores; tkv=256 fills the MXU N dimension on v6e/v7x.
_TQ, _TKV = 128, 256

_VMEM_LIMIT = None


def _vmem_limit_bytes():
    """Per-generation scoped-VMEM budget: ~3/4 of physical, capped at 96 MiB
    -> 96 MiB on v5e/v6e (128 MiB phys), 48 MiB on v7x (64 MiB phys)."""
    global _VMEM_LIMIT
    if _VMEM_LIMIT is None:
        try:
            phys = pltpu.get_tpu_info().vmem_capacity_bytes
        except Exception:        # no TPU / interpret mode / older API
            phys = 64 * 1024 * 1024
        _VMEM_LIMIT = int(min(96 * 1024 * 1024, (phys * 3) // 4))
    return _VMEM_LIMIT


def _tile(dim, target):
    """Largest tile <= target (halving, >=128 to stay lane-aligned) dividing
    `dim`; falls back to the full extent, which is always a legal block."""
    if dim <= target:
        return dim
    t = target
    while t >= 128:
        if dim % t == 0:
            return t
        t //= 2
    return dim


def _attn_tiles(n):
    """(tq, tkv, padded N).  N <= 128 -> full-extent blocks, no padding."""
    if n <= _TQ:
        return n, n, n
    n_pad = ((n + _TQ - 1) // _TQ) * _TQ
    tkv = _TKV if n_pad % _TKV == 0 else _TQ
    return _TQ, tkv, n_pad


# ----------------------------- projection kernels ----------------------------

def _matmul_kernel(x_ref, w_ref, o_ref):
    # Full-K block -> single MXU pass, no accumulator scratch / pl.when.
    o_ref[...] = jnp.dot(x_ref[...].astype(_MXU_DTYPE),
                         w_ref[...].astype(_MXU_DTYPE),
                         preferred_element_type=jnp.float32).astype(o_ref.dtype)


def _matmul_bias_kernel(x_ref, w_ref, b_ref, o_ref):
    acc = jnp.dot(x_ref[...].astype(_MXU_DTYPE),
                  w_ref[...].astype(_MXU_DTYPE),
                  preferred_element_type=jnp.float32)
    o_ref[...] = (acc + b_ref[...].astype(jnp.float32)).astype(o_ref.dtype)


def _matmul_call(kernel, args, M, K, O, out_dtype, extra_in_specs=()):
    tm, tn = _tile(M, _TM), _tile(O, _TN)
    grid = (M // tm, O // tn)   # i outer, j inner: x streamed once,
    #                             weights re-fetched only M/tm (<=2) times.
    cost = pl.CostEstimate(
        flops=2 * M * K * O,
        transcendentals=0,
        bytes_accessed=2 * (M * K + (M // tm) * K * O) + M * O * 4)

    in_specs = [
        pl.BlockSpec((tm, K), lambda i, j: (i, 0)),   # activations
        pl.BlockSpec((K, tn), lambda i, j: (0, j)),   # weights (lane-dense)
    ] + list(extra_in_specs)

    return pl.pallas_call(
        kernel,
        out_shape=jax.ShapeDtypeStruct((M, O), out_dtype),
        grid=grid,
        in_specs=in_specs,
        out_specs=pl.BlockSpec((tm, tn), lambda i, j: (i, j)),
        compiler_params=pltpu.CompilerParams(
            dimension_semantics=("parallel", "parallel"),
            vmem_limit_bytes=_vmem_limit_bytes()),
        cost_estimate=cost,
    )(*args)


def pallas_qkv_proj(x, w_qkv):
    """x: (M, C) @ w_qkv: (C, 3C) -> packed qkv (M, 3C) in bf16 (no bias)."""
    M, K = x.shape
    O = w_qkv.shape[1]
    return _matmul_call(_matmul_kernel, (x, w_qkv), M, K, O, _ACT_DTYPE)


def pallas_linear_bias(x, w, b, out_dtype):
    """x: (M, K) @ w: (K, O) + b: (O,) -> (M, O)."""
    M, K = x.shape
    O = w.shape[1]
    tn = _tile(O, _TN)
    b_spec = pl.BlockSpec((1, tn), lambda i, j: (0, j))
    return _matmul_call(_matmul_bias_kernel, (x, w, b.reshape(1, O)),
                        M, K, O, out_dtype, extra_in_specs=(b_spec,))


# --------------------------- flash-style attention ---------------------------

def _flash_attn_kernel(q_ref, k_ref, v_ref, o_ref, m_ref, l_ref, acc_ref,
                       *, num_heads, scale, n_valid, n_padded):
    """One (batch, q-tile, kv-tile) step of online-softmax attention.

    q_ref/o_ref: (1, tq, C); k_ref/v_ref: (1, tkv, C), heads packed along C.
    Scratch: m/l (H, tq, 1) running max / denominator, acc (H, tq, D) f32
    numerator, carried across the last ('arbitrary') kv grid axis.
    """
    kv_i = pl.program_id(2)

    @pl.when(kv_i == 0)
    def _init():
        m_ref[...] = jnp.full_like(m_ref, -jnp.inf)
        l_ref[...] = jnp.zeros_like(l_ref)
        acc_ref[...] = jnp.zeros_like(acc_ref)

    H = num_heads
    tq, C = q_ref.shape[1], q_ref.shape[2]
    tkv = k_ref.shape[1]
    D = C // H

    # Fold the softmax scale into q once per block (f32 multiply, then back to
    # bf16 MXU operands); head split is one (tq, C) -> (H, tq, D) relayout per
    # operand instead of H separate 64-lane slices.
    q = (q_ref[0].astype(jnp.float32) * scale).astype(_MXU_DTYPE)
    q = jnp.swapaxes(q.reshape(tq, H, D), 0, 1)             # (H, tq,  D)
    k = jnp.swapaxes(k_ref[0].reshape(tkv, H, D), 0, 1)     # (H, tkv, D) bf16
    v = jnp.swapaxes(v_ref[0].reshape(tkv, H, D), 0, 1)     # (H, tkv, D) bf16

    # Batched q @ k^T over heads -> (H, tq, tkv) f32 scores.
    s = jnp.einsum("hqd,hkd->hqk", q, k, preferred_element_type=jnp.float32)

    if n_valid < n_padded:   # static: mask padded key columns with -inf
        key_idx = kv_i * tkv + lax.broadcasted_iota(jnp.int32, (1, 1, tkv), 2)
        s = jnp.where(key_idx < n_valid, s, -jnp.inf)

    m_prev = m_ref[...]                                       # (H, tq, 1)
    m_new = jnp.maximum(m_prev, jnp.max(s, axis=-1, keepdims=True))
    alpha = jnp.exp(m_prev - m_new)        # f32 softmax math (v5e has no bf16 VPU)
    p = jnp.exp(s - m_new)                                    # (H, tq, tkv) f32
    l_ref[...] = alpha * l_ref[...] + jnp.sum(p, axis=-1, keepdims=True)
    # Cast p to bf16 immediately after the exp (vreg pressure + MXU operand).
    acc_ref[...] = alpha * acc_ref[...] + jnp.einsum(
        "hqk,hkd->hqd", p.astype(_MXU_DTYPE), v,
        preferred_element_type=jnp.float32)
    m_ref[...] = m_new

    @pl.when(kv_i == pl.num_programs(2) - 1)
    def _finalize():
        inv_l = pl.reciprocal(l_ref[...], approx=True)        # EUP, (H, tq, 1)
        o = acc_ref[...] * inv_l                              # (H, tq, D) f32
        # Merge heads back into lanes; one dense (tq, C) store (no masked vst).
        o_ref[0] = jnp.swapaxes(o, 0, 1).reshape(tq, C).astype(o_ref.dtype)


def pallas_flash_attention(qkv, *, num_heads, scale, seq_len, tq, tkv):
    """qkv: (B, Np, 3C) bf16 with [q|k|v] packed along the last dim (heads
    packed within each C block).  Returns (B, Np, C) bf16."""
    B, Np, C3 = qkv.shape
    C = C3 // 3
    D = C // num_heads
    grid = (B, Np // tq, Np // tkv)

    # Same array passed three times; the q/k/v split is pure BlockSpec column
    # indexing (block index 0/1/2 along the 3C axis) -> no HBM slices.
    q_spec = pl.BlockSpec((1, tq, C), lambda b, qi, ki: (b, qi, 0))
    k_spec = pl.BlockSpec((1, tkv, C), lambda b, qi, ki: (b, ki, 1))
    v_spec = pl.BlockSpec((1, tkv, C), lambda b, qi, ki: (b, ki, 2))
    o_spec = pl.BlockSpec((1, tq, C), lambda b, qi, ki: (b, qi, 0))

    cost = pl.CostEstimate(
        flops=4 * B * Np * Np * C,
        transcendentals=B * num_heads * Np * Np,
        bytes_accessed=2 * B * Np * C * (2 + 2 * (Np // tq)))

    return pl.pallas_call(
        partial(_flash_attn_kernel, num_heads=num_heads, scale=scale,
                n_valid=seq_len, n_padded=Np),
        out_shape=jax.ShapeDtypeStruct((B, Np, C), qkv.dtype),
        grid=grid,
        in_specs=[q_spec, k_spec, v_spec],
        out_specs=o_spec,
        scratch_shapes=[
            pltpu.VMEM((num_heads, tq, 1), jnp.float32),   # running max m
            pltpu.VMEM((num_heads, tq, 1), jnp.float32),   # running denom l
            pltpu.VMEM((num_heads, tq, D), jnp.float32),   # running numerator
        ],
        compiler_params=pltpu.CompilerParams(
            dimension_semantics=("parallel", "parallel", "arbitrary"),
            vmem_limit_bytes=_vmem_limit_bytes()),
        cost_estimate=cost,
    )(qkv, qkv, qkv)


# ------------------------------ module wrapper --------------------------------

def init_attention_params(key, dim, num_heads, qkv_bias=False):
    del num_heads, qkv_bias   # qkv_bias=False -> no qkv bias parameter
    k1, k2, k3 = jax.random.split(key, 3)
    std = dim ** -0.5
    # Weights stored pre-transposed (in, out) and pre-cast to bf16 (review #2);
    # the tiny proj bias stays f32 and is added to the f32 accumulator.
    return dict(
        w_qkv=(jax.random.normal(k1, (dim, 3 * dim), jnp.float32) * std
               ).astype(_ACT_DTYPE),
        w_proj=(jax.random.normal(k2, (dim, dim), jnp.float32) * std
                ).astype(_ACT_DTYPE),
        b_proj=jax.random.normal(k3, (dim,), jnp.float32) * 0.02,
    )


@partial(jax.jit, static_argnames=("num_heads",))
def attention_forward(params, x, num_heads):
    B, N, C = x.shape
    assert C % num_heads == 0
    D = C // num_heads
    scale = D ** -0.5

    # Pad the sequence to a multiple of 128 (padded keys are masked to -inf in
    # the kernel, padded query rows sliced off below); keeps blocks
    # (8,128)-aligned and the q/kv grid multi-block for v7x core sharding.
    tq, tkv, Np = _attn_tiles(N)
    xp = x.astype(_ACT_DTYPE)                       # bf16 activations in HBM
    if Np != N:
        xp = jnp.pad(xp, ((0, 0), (0, Np - N), (0, 0)))
    M = B * Np

    # 1) fused qkv projection against the unsplit weight -> packed (M, 3C).
    qkv = pallas_qkv_proj(xp.reshape(M, C), params["w_qkv"])
    qkv = qkv.reshape(B, Np, 3 * C)

    # 2) flash attention; heads stay packed along C so no HBM transpose ever.
    o = pallas_flash_attention(qkv, num_heads=num_heads, scale=scale,
                               seq_len=N, tq=tq, tkv=tkv)        # (B, Np, C)

    # 3) output projection + bias (heads already merged in C).
    out = pallas_linear_bias(o.reshape(M, C), params["w_proj"],
                             params["b_proj"], out_dtype=x.dtype)
    out = out.reshape(B, Np, C)
    return out[:, :N] if Np != N else out


def attention_reference(params, x, num_heads):
    """Pure-JAX reference of the PyTorch module, mirroring the kernels'
    precision policy: bf16 MXU operands and bf16 inter-stage activations,
    f32 accumulation and f32 softmax."""
    B, N, C = x.shape
    D = C // num_heads
    scale = D ** -0.5
    bf = _MXU_DTYPE

    def mm(a, b):
        return jnp.matmul(a.astype(bf), b.astype(bf),
                          preferred_element_type=jnp.float32)

    qkv = mm(x, params["w_qkv"]).astype(bf)
    qkv = qkv.reshape(B, N, 3, num_heads, D).transpose(2, 0, 3, 1, 4)
    q, k, v = qkv[0], qkv[1], qkv[2]                         # (B, H, N, D)
    q = (q.astype(jnp.float32) * scale).astype(bf)           # scale folded into q
    attn = jax.nn.softmax(mm(q, jnp.swapaxes(k, -2, -1)), axis=-1)
    o = mm(attn, v).transpose(0, 2, 1, 3).reshape(B, N, C).astype(bf)
    return (mm(o, params["w_proj"]) + params["b_proj"]).astype(x.dtype)


if __name__ == "__main__":
    # Primary check: small shapes; C=128 keeps every block lane-aligned so the
    # exact same BlockSpecs are legal on real hardware as well.
    B, N, C, H = 2, 8, 128, 4
    key = jax.random.PRNGKey(0)
    kx, kp, kx2, kp2 = jax.random.split(key, 4)

    x = jax.random.normal(kx, (B, N, C), jnp.float32)
    params = init_attention_params(kp, C, H, qkv_bias=False)

    out = jax.block_until_ready(attention_forward(params, x, num_heads=H))
    assert out.shape == (B, N, C)
    assert bool(jnp.all(jnp.isfinite(out)))

    ref = attention_reference(params, x, H)
    # Only divergences vs the precision-mirrored reference: where the attention
    # weights are rounded to bf16 (pre- vs post-normalization) and the EUP
    # approx reciprocal (~1e-3 rel).  Structural bugs would be O(1) errors.
    assert jnp.allclose(out, ref, atol=5e-2, rtol=5e-2), \
        float(jnp.max(jnp.abs(out - ref)))

    # Second check: non-multiple-of-128 sequence -> exercises padding, -inf key
    # masking, and the multi-block online-softmax accumulation.
    B2, N2, C2, H2 = 2, 300, 256, 4
    x2 = jax.random.normal(kx2, (B2, N2, C2), jnp.float32)
    params2 = init_attention_params(kp2, C2, H2, qkv_bias=False)
    out2 = jax.block_until_ready(attention_forward(params2, x2, num_heads=H2))
    ref2 = attention_reference(params2, x2, H2)
    assert out2.shape == (B2, N2, C2)
    assert jnp.allclose(out2, ref2, atol=5e-2, rtol=5e-2), \
        float(jnp.max(jnp.abs(out2 - ref2)))

    print("KERNEL_OK")
</pallas_src>

<mosaic_0001>
module attributes {stable_mosaic.version = 11 : i64} {
  func.func @_matmul_kernel(%arg0: i32, %arg1: i32, %arg2: memref<16x128xbf16, #tpu.memory_space<vmem>>, %arg3: memref<128x128xbf16, #tpu.memory_space<vmem>>, %arg4: memref<16x128xbf16, #tpu.memory_space<vmem>>) attributes {dimension_semantics = [#tpu.dimension_semantics<parallel>, #tpu.dimension_semantics<parallel>], iteration_bounds = array<i64: 1, 3>, scalar_prefetch = 0 : i64, scratch_operands = 0 : i64, tpu.core_type = #tpu.core_type<tc>, window_params = [{transform_indices = @transform_0, window_bounds = array<i64: 16, 128>}, {transform_indices = @transform_1, window_bounds = array<i64: 128, 128>}, {transform_indices = @transform_2, window_bounds = array<i64: 16, 128>}]} {
    %c0 = arith.constant 0 : index
    %c0_0 = arith.constant 0 : index
    %0 = vector.load %arg2[%c0, %c0_0] : memref<16x128xbf16, #tpu.memory_space<vmem>>, vector<16x128xbf16>
    %c0_1 = arith.constant 0 : index
    %c0_2 = arith.constant 0 : index
    %1 = vector.load %arg3[%c0_1, %c0_2] : memref<128x128xbf16, #tpu.memory_space<vmem>>, vector<128x128xbf16>
    %cst = arith.constant dense<0.000000e+00> : vector<16x128xf32>
    %2 = tpu.matmul %0, %1, %cst {dimension_numbers = #tpu.dot_dimension_numbers<[1], [0], [0], [1], [0, 0, 1, 1], [], []>} : vector<16x128xbf16>, vector<128x128xbf16>, vector<16x128xf32> -> vector<16x128xf32>
    %3 = arith.truncf %2 : vector<16x128xf32> to vector<16x128xbf16>
    %c0_3 = arith.constant 0 : index
    %c0_4 = arith.constant 0 : index
    %4 = vector.load %arg4[%c0_3, %c0_4] : memref<16x128xbf16, #tpu.memory_space<vmem>>, vector<16x128xbf16>
    tpu.vector_store %arg4[%c0_3, %c0_4], %3 {strides = array<i32>} : memref<16x128xbf16, #tpu.memory_space<vmem>>, vector<16x128xbf16>,
    return
  }
  func.func @transform_0(%arg0: i32, %arg1: i32) -> (i32, i32) {
    %c0_i32 = arith.constant 0 : i32
    %c0_i32_0 = arith.constant 0 : i32
    return %arg0, %c0_i32 : i32, i32
  }
  func.func @transform_1(%arg0: i32, %arg1: i32) -> (i32, i32) {
    %c0_i32 = arith.constant 0 : i32
    %c0_i32_0 = arith.constant 0 : i32
    return %c0_i32, %arg1 : i32, i32
  }
  func.func @transform_2(%arg0: i32, %arg1: i32) -> (i32, i32) {
    %c0_i32 = arith.constant 0 : i32
    return %arg0, %arg1 : i32, i32
  }
}

module attributes {stable_mosaic.version = 11 : i64} {
  func.func @_matmul_bias_kernel(%arg0: i32, %arg1: i32, %arg2: memref<16x128xbf16, #tpu.memory_space<vmem>>, %arg3: memref<128x128xbf16, #tpu.memory_space<vmem>>, %arg4: memref<1x128xf32, #tpu.memory_space<vmem>>, %arg5: memref<16x128xf32, #tpu.memory_space<vmem>>) attributes {dimension_semantics = [#tpu.dimension_semantics<parallel>, #tpu.dimension_semantics<parallel>], iteration_bounds = array<i64: 1, 1>, scalar_prefetch = 0 : i64, scratch_operands = 0 : i64, tpu.core_type = #tpu.core_type<tc>, window_params = [{transform_indices = @transform_0, window_bounds = array<i64: 16, 128>}, {transform_indices = @transform_1, window_bounds = array<i64: 128, 128>}, {transform_indices = @transform_2, window_bounds = array<i64: 1, 128>}, {transform_indices = @transform_3, window_bounds = array<i64: 16, 128>}]} {
    %c0 = arith.constant 0 : index
    %c0_0 = arith.constant 0 : index
    %0 = vector.load %arg2[%c0, %c0_0] : memref<16x128xbf16, #tpu.memory_space<vmem>>, vector<16x128xbf16>
    %c0_1 = arith.constant 0 : index
    %c0_2 = arith.constant 0 : index
    %1 = vector.load %arg3[%c0_1, %c0_2] : memref<128x128xbf16, #tpu.memory_space<vmem>>, vector<128x128xbf16>
    %cst = arith.constant dense<0.000000e+00> : vector<16x128xf32>
    %2 = tpu.matmul %0, %1, %cst {dimension_numbers = #tpu.dot_dimension_numbers<[1], [0], [0], [1], [0, 0, 1, 1], [], []>} : vector<16x128xbf16>, vector<128x128xbf16>, vector<16x128xf32> -> vector<16x128xf32>
    %c0_3 = arith.constant 0 : index
    %c0_4 = arith.constant 0 : index
    %3 = vector.load %arg4[%c0_3, %c0_4] : memref<1x128xf32, #tpu.memory_space<vmem>>, vector<1x128xf32>
    %4 = vector.broadcast %3 : vector<1x128xf32> to vector<16x128xf32>
    %5 = arith.addf %2, %4 : vector<16x128xf32>
    %c0_5 = arith.constant 0 : index
    %c0_6 = arith.constant 0 : index
    %6 = vector.load %arg5[%c0_5, %c0_6] : memref<16x128xf32, #tpu.memory_space<vmem>>, vector<16x128xf32>
    tpu.vector_store %arg5[%c0_5, %c0_6], %5 {strides = array<i32>} : memref<16x128xf32, #tpu.memory_space<vmem>>, vector<16x128xf32>,
    return
  }
  func.func @transform_0(%arg0: i32, %arg1: i32) -> (i32, i32) {
    %c0_i32 = arith.constant 0 : i32
    %c0_i32_0 = arith.constant 0 : i32
    return %arg0, %c0_i32 : i32, i32
  }
  func.func @transform_1(%arg0: i32, %arg1: i32) -> (i32, i32) {
    %c0_i32 = arith.constant 0 : i32
    %c0_i32_0 = arith.constant 0 : i32
    return %c0_i32, %arg1 : i32, i32
  }
  func.func @transform_2(%arg0: i32, %arg1: i32) -> (i32, i32) {
    %c0_i32 = arith.constant 0 : i32
    %c0_i32_0 = arith.constant 0 : i32
    return %c0_i32, %arg1 : i32, i32
  }
  func.func @transform_3(%arg0: i32, %arg1: i32) -> (i32, i32) {
    %c0_i32 = arith.constant 0 : i32
    return %arg0, %arg1 : i32, i32
  }
}

module attributes {stable_mosaic.version = 11 : i64} {
  func.func @_flash_attn_kernel(%arg0: i32, %arg1: i32, %arg2: i32, %arg3: memref<1x8x128xbf16, #tpu.memory_space<vmem>>, %arg4: memref<1x8x128xbf16, #tpu.memory_space<vmem>>, %arg5: memref<1x8x128xbf16, #tpu.memory_space<vmem>>, %arg6: memref<1x8x128xbf16, #tpu.memory_space<vmem>>, %arg7: memref<4x8x1xf32, #tpu.memory_space<vmem>>, %arg8: memref<4x8x1xf32, #tpu.memory_space<vmem>>, %arg9: memref<4x8x32xf32, #tpu.memory_space<vmem>>) attributes {dimension_semantics = [#tpu.dimension_semantics<parallel>, #tpu.dimension_semantics<parallel>, #tpu.dimension_semantics<arbitrary>], iteration_bounds = array<i64: 2, 1, 1>, scalar_prefetch = 0 : i64, scratch_operands = 3 : i64, tpu.core_type = #tpu.core_type<tc>, window_params = [{transform_indices = @transform_0, window_bounds = array<i64: 1, 8, 128>}, {transform_indices = @transform_1, window_bounds = array<i64: 1, 8, 128>}, {transform_indices = @transform_2, window_bounds = array<i64: 1, 8, 128>}, {transform_indices = @transform_3, window_bounds = array<i64: 1, 8, 128>}]} {
    %c0_i32 = arith.constant 0 : i32
    %0 = arith.cmpi eq, %arg2, %c0_i32 : i32
    %1 = arith.extui %0 : i1 to i32
    %c0_i32_0 = arith.constant 0 : i32
    %2 = arith.cmpi ne, %1, %c0_i32_0 : i32
    scf.if %2 {
      %cst_33 = arith.constant 0xFF800000 : f32
      %46 = vector.broadcast %cst_33 : f32 to vector<4x8x1xf32>
      %c0_34 = arith.constant 0 : index
      %c0_35 = arith.constant 0 : index
      %c0_36 = arith.constant 0 : index
      %47 = vector.load %arg7[%c0_34, %c0_35, %c0_36] : memref<4x8x1xf32, #tpu.memory_space<vmem>>, vector<4x8x1xf32>
      tpu.vector_store %arg7[%c0_34, %c0_35, %c0_36], %46 {strides = array<i32>} : memref<4x8x1xf32, #tpu.memory_space<vmem>>, vector<4x8x1xf32>,
      %cst_37 = arith.constant 0.000000e+00 : f32
      %48 = vector.broadcast %cst_37 : f32 to vector<4x8x1xf32>
      %c0_38 = arith.constant 0 : index
      %c0_39 = arith.constant 0 : index
      %c0_40 = arith.constant 0 : index
      %49 = vector.load %arg8[%c0_38, %c0_39, %c0_40] : memref<4x8x1xf32, #tpu.memory_space<vmem>>, vector<4x8x1xf32>
      tpu.vector_store %arg8[%c0_38, %c0_39, %c0_40], %48 {strides = array<i32>} : memref<4x8x1xf32, #tpu.memory_space<vmem>>, vector<4x8x1xf32>,
      %cst_41 = arith.constant 0.000000e+00 : f32
      %50 = vector.broadcast %cst_41 : f32 to vector<4x8x32xf32>
      %c0_42 = arith.constant 0 : index
      %c0_43 = arith.constant 0 : index
      %c0_44 = arith.constant 0 : index
      %51 = vector.load %arg9[%c0_42, %c0_43, %c0_44] : memref<4x8x32xf32, #tpu.memory_space<vmem>>, vector<4x8x32xf32>
      tpu.vector_store %arg9[%c0_42, %c0_43, %c0_44], %50 {strides = array<i32>} : memref<4x8x32xf32, #tpu.memory_space<vmem>>, vector<4x8x32xf32>,
    } else {
    }
    %c0 = arith.constant 0 : index
    %c0_1 = arith.constant 0 : index
    %c0_2 = arith.constant 0 : index
    %3 = vector.load %arg3[%c0, %c0_1, %c0_2] : memref<1x8x128xbf16, #tpu.memory_space<vmem>>, vector<1x8x128xbf16>
    %4 = vector.shape_cast %3 : vector<1x8x128xbf16> to vector<8x128xbf16>
    %5 = arith.extf %4 : vector<8x128xbf16> to vector<8x128xf32>
    %cst = arith.constant 0.176776692 : f32
    %6 = vector.broadcast %cst : f32 to vector<8x128xf32>
    %7 = arith.mulf %5, %6 : vector<8x128xf32>
    %8 = arith.truncf %7 : vector<8x128xf32> to vector<8x128xbf16>
    %9 = vector.shape_cast %8 : vector<8x128xbf16> to vector<8x4x32xbf16>
    %10 = tpu.transpose %9, [1, 0, 2] : vector<8x4x32xbf16> -> vector<4x8x32xbf16>
    %c0_3 = arith.constant 0 : index
    %c0_4 = arith.constant 0 : index
    %c0_5 = arith.constant 0 : index
    %11 = vector.load %arg4[%c0_3, %c0_4, %c0_5] : memref<1x8x128xbf16, #tpu.memory_space<vmem>>, vector<1x8x128xbf16>
    %12 = vector.shape_cast %11 : vector<1x8x128xbf16> to vector<8x128xbf16>
    %13 = vector.shape_cast %12 : vector<8x128xbf16> to vector<8x4x32xbf16>
    %14 = tpu.transpose %13, [1, 0, 2] : vector<8x4x32xbf16> -> vector<4x8x32xbf16>
    %c0_6 = arith.constant 0 : index
    %c0_7 = arith.constant 0 : index
    %c0_8 = arith.constant 0 : index
    %15 = vector.load %arg5[%c0_6, %c0_7, %c0_8] : memref<1x8x128xbf16, #tpu.memory_space<vmem>>, vector<1x8x128xbf16>
    %16 = vector.shape_cast %15 : vector<1x8x128xbf16> to vector<8x128xbf16>
    %17 = vector.shape_cast %16 : vector<8x128xbf16> to vector<8x4x32xbf16>
    %18 = tpu.transpose %17, [1, 0, 2] : vector<8x4x32xbf16> -> vector<4x8x32xbf16>
    "tpu.trace_start"() <{level = 10 : i32, message = "hqd,hkd->hqk"}> : () -> ()
    %cst_9 = arith.constant dense<0.000000e+00> : vector<4x8x8xf32>
    %19 = tpu.matmul %10, %14, %cst_9 {dimension_numbers = #tpu.dot_dimension_numbers<[2], [2], [1], [1], [0, 0, 0, 1, 1, 1], [0], [0]>} : vector<4x8x32xbf16>, vector<4x8x32xbf16>, vector<4x8x8xf32> -> vector<4x8x8xf32>
    "tpu.trace_stop"() : () -> ()
    %c0_10 = arith.constant 0 : index
    %c0_11 = arith.constant 0 : index
    %c0_12 = arith.constant 0 : index
    %20 = vector.load %arg7[%c0_10, %c0_11, %c0_12] : memref<4x8x1xf32, #tpu.memory_space<vmem>>, vector<4x8x1xf32>
    %cst_13 = arith.constant dense<0xFF800000> : vector<4x8xf32>
    %21 = vector.multi_reduction <maximumf>, %19, %cst_13 [2] : vector<4x8x8xf32> to vector<4x8xf32>
    %22 = vector.shape_cast %21 : vector<4x8xf32> to vector<4x8x1xf32>
    %23 = arith.maximumf %20, %22 : vector<4x8x1xf32>
    %24 = arith.subf %20, %23 : vector<4x8x1xf32>
    %25 = math.exp %24 : vector<4x8x1xf32>
    %26 = vector.broadcast %23 : vector<4x8x1xf32> to vector<4x8x8xf32>
    %27 = arith.subf %19, %26 : vector<4x8x8xf32>
    %28 = math.exp %27 : vector<4x8x8xf32>
    %c0_14 = arith.constant 0 : index
    %c0_15 = arith.constant 0 : index
    %c0_16 = arith.constant 0 : index
    %29 = vector.load %arg8[%c0_14, %c0_15, %c0_16] : memref<4x8x1xf32, #tpu.memory_space<vmem>>, vector<4x8x1xf32>
    %30 = arith.mulf %25, %29 : vector<4x8x1xf32>
    %cst_17 = arith.constant dense<0.000000e+00> : vector<4x8xf32>
    %31 = vector.multi_reduction <add>, %28, %cst_17 [2] : vector<4x8x8xf32> to vector<4x8xf32>
    %32 = vector.shape_cast %31 : vector<4x8xf32> to vector<4x8x1xf32>
    %33 = arith.addf %30, %32 : vector<4x8x1xf32>
    %c0_18 = arith.constant 0 : index
    %c0_19 = arith.constant 0 : index
    %c0_20 = arith.constant 0 : index
    %34 = vector.load %arg8[%c0_18, %c0_19, %c0_20] : memref<4x8x1xf32, #tpu.memory_space<vmem>>, vector<4x8x1xf32>
    tpu.vector_store %arg8[%c0_18, %c0_19, %c0_20], %33 {strides = array<i32>} : memref<4x8x1xf32, #tpu.memory_space<vmem>>, vector<4x8x1xf32>,
    %c0_21 = arith.constant 0 : index
    %c0_22 = arith.constant 0 : index
    %c0_23 = arith.constant 0 : index
    %35 = vector.load %arg9[%c0_21, %c0_22, %c0_23] : memref<4x8x32xf32, #tpu.memory_space<vmem>>, vector<4x8x32xf32>
    %36 = vector.broadcast %25 : vector<4x8x1xf32> to vector<4x8x32xf32>
    %37 = arith.mulf %36, %35 : vector<4x8x32xf32>
    %38 = arith.truncf %28 : vector<4x8x8xf32> to vector<4x8x8xbf16>
    "tpu.trace_start"() <{level = 10 : i32, message = "hqk,hkd->hqd"}> : () -> ()
    %cst_24 = arith.constant dense<0.000000e+00> : vector<4x8x32xf32>
    %39 = tpu.matmul %38, %18, %cst_24 {dimension_numbers = #tpu.dot_dimension_numbers<[2], [1], [1], [2], [0, 0, 0, 1, 1, 2], [0], [0]>} : vector<4x8x8xbf16>, vector<4x8x32xbf16>, vector<4x8x32xf32> -> vector<4x8x32xf32>
    "tpu.trace_stop"() : () -> ()
    %40 = arith.addf %37, %39 : vector<4x8x32xf32>
    %c0_25 = arith.constant 0 : index
    %c0_26 = arith.constant 0 : index
    %c0_27 = arith.constant 0 : index
    %41 = vector.load %arg9[%c0_25, %c0_26, %c0_27] : memref<4x8x32xf32, #tpu.memory_space<vmem>>, vector<4x8x32xf32>
    tpu.vector_store %arg9[%c0_25, %c0_26, %c0_27], %40 {strides = array<i32>} : memref<4x8x32xf32, #tpu.memory_space<vmem>>, vector<4x8x32xf32>,
    %c0_28 = arith.constant 0 : index
    %c0_29 = arith.constant 0 : index
    %c0_30 = arith.constant 0 : index
    %42 = vector.load %arg7[%c0_28, %c0_29, %c0_30] : memref<4x8x1xf32, #tpu.memory_space<vmem>>, vector<4x8x1xf32>
    tpu.vector_store %arg7[%c0_28, %c0_29, %c0_30], %23 {strides = array<i32>} : memref<4x8x1xf32, #tpu.memory_space<vmem>>, vector<4x8x1xf32>,
    %c0_i32_31 = arith.constant 0 : i32
    %43 = arith.cmpi eq, %arg2, %c0_i32_31 : i32
    %44 = arith.extui %43 : i1 to i32
    %c0_i32_32 = arith.constant 0 : i32
    %45 = arith.cmpi ne, %44, %c0_i32_32 : i32
    scf.if %45 {
      %c0_33 = arith.constant 0 : index
      %c0_34 = arith.constant 0 : index
      %c0_35 = arith.constant 0 : index
      %46 = vector.load %arg8[%c0_33, %c0_34, %c0_35] : memref<4x8x1xf32, #tpu.memory_space<vmem>>, vector<4x8x1xf32>
      %47 = tpu.reciprocal %46 {approx = true} : vector<4x8x1xf32> -> vector<4x8x1xf32>
      %c0_36 = arith.constant 0 : index
      %c0_37 = arith.constant 0 : index
      %c0_38 = arith.constant 0 : index
      %48 = vector.load %arg9[%c0_36, %c0_37, %c0_38] : memref<4x8x32xf32, #tpu.memory_space<vmem>>, vector<4x8x32xf32>
      %49 = vector.broadcast %47 : vector<4x8x1xf32> to vector<4x8x32xf32>
      %50 = arith.mulf %48, %49 : vector<4x8x32xf32>
      %51 = tpu.transpose %50, [1, 0, 2] : vector<4x8x32xf32> -> vector<8x4x32xf32>
      %52 = vector.shape_cast %51 : vector<8x4x32xf32> to vector<8x128xf32>
      %53 = arith.truncf %52 : vector<8x128xf32> to vector<8x128xbf16>
      %c0_39 = arith.constant 0 : index
      %c0_40 = arith.constant 0 : index
      %c0_41 = arith.constant 0 : index
      %54 = vector.load %arg6[%c0_39, %c0_40, %c0_41] : memref<1x8x128xbf16, #tpu.memory_space<vmem>>, vector<1x8x128xbf16>
      %55 = vector.shape_cast %54 : vector<1x8x128xbf16> to vector<8x128xbf16>
      %56 = vector.shape_cast %53 : vector<8x128xbf16> to vector<1x8x128xbf16>
      tpu.vector_store %arg6[%c0_39, %c0_40, %c0_41], %56 {strides = array<i32>} : memref<1x8x128xbf16, #tpu.memory_space<vmem>>, vector<1x8x128xbf16>,
    } else {
    }
    return
  }
  func.func @transform_0(%arg0: i32, %arg1: i32, %arg2: i32) -> (i32, i32, i32) {
    %c0_i32 = arith.constant 0 : i32
    %c0_i32_0 = arith.constant 0 : i32
    return %arg0, %arg1, %c0_i32 : i32, i32, i32
  }
  func.func @transform_1(%arg0: i32, %arg1: i32, %arg2: i32) -> (i32, i32, i32) {
    %c1_i32 = arith.constant 1 : i32
    %c0_i32 = arith.constant 0 : i32
    return %arg0, %arg2, %c1_i32 : i32, i32, i32
  }
  func.func @transform_2(%arg0: i32, %arg1: i32, %arg2: i32) -> (i32, i32, i32) {
    %c2_i32 = arith.constant 2 : i32
    %c0_i32 = arith.constant 0 : i32
    return %arg0, %arg2, %c2_i32 : i32, i32, i32
  }
  func.func @transform_3(%arg0: i32, %arg1: i32, %arg2: i32) -> (i32, i32, i32) {
    %c0_i32 = arith.constant 0 : i32
    %c0_i32_0 = arith.constant 0 : i32
    return %arg0, %arg1, %c0_i32 : i32, i32, i32
  }
}

</mosaic_0001>

<bundles_post_ra>
// kernel: attention_forward.5
= control target key start
LH: loop header
LB: loop body
LE: loop exit
PB: predicated region body
PF: predicated region fallthrough
CT: control target
= control target key end

     0   :  { %v229_v1 = vmov 0.0   ;;  %vm230_vm0 = vmmov 0   ;;  %s287_s0 = inlined_call_operand.vmem [shape: bf16[16,128], index: 0, kind: input, shape index: {}]   ;;  %s288_s1 = inlined_call_operand.vmem [shape: bf16[128,128], index: 1, kind: input, shape index: {}]   ;;  %s289_s2 = inlined_call_operand.vmem [shape: f32[1,128], index: 2, kind: input, shape index: {}]   ;;  %s290_s3 = inlined_call_operand.hbm [shape: f32[16,128], index: 3, kind: output, shape index: {}]  }
   0x1   :  { %v198_v0 = vld [vmem:[%s288_s1 + $0x38] sm:$0xff]   ;;  %173 = vmatprep.subr.bf16.mxu0 %v229_v1  ;;  %v199_v2 = vld [vmem:[%s288_s1 + $0x30] sm:$0xff]   ;;  %189 = vmatprep.mubr.msk.bf16.mxu0 %vm230_vm0, %v229_v1  ;;  %v200_v3 = vld [vmem:[%s288_s1 + $0x28] sm:$0xff]  }
   0x2   :  { %174 = vmatpush3.bf16.msra.mxu0 %v198_v0 }
   0x3   :  { %175 = vmatprep.subr.bf16.mxu0 %v229_v1 }
   0x6   :  { %176 = vmatpush3.bf16.msra.mxu0 %v199_v2 }
   0x7   :  { %177 = vmatprep.subr.bf16.mxu0 %v229_v1 }
   0x8   :  { %8 = vsyncpa [#allocation3], 0  ;;  %v201_v4 = vld [vmem:[%s288_s1 + $0x20] sm:$0xff]   ;;  %v202_v5 = vld [vmem:[%s288_s1 + $0x18] sm:$0xff]   ;;  %s231_s5 = smov [#allocation2]  }
   0x9   :  { %v203_v6 = vld [vmem:[%s288_s1 + $0x10] sm:$0xff]   ;;  %v204_v7 = vld [vmem:[%s288_s1 + $0x8] sm:$0xff]   ;;  %v205_v8 = vld [vmem:[%s288_s1] sm:$0xff]   ;;  %s143_s6 = sshll.u32 %s231_s5, 4  ;;  %s144_s6 = int_to_ptr.vmem [resolvable:$true] %s143_s6 }
   0xa   :  { %178 = vmatpush3.bf16.msra.mxu0 %v200_v3  ;;  %v206_v9 = vld [vmem:[%s287_s0] sm:$0xff]   ;;  %s207_s1 = scalar_lea.vmem %s144_s6, 256  ;;  %p212_p1 = scmp.lt.s32.totalorder %s144_s6, %s144_s6 }
   0xb   :  { %179 = vmatprep.subr.bf16.mxu0 %v229_v1  ;;  %v154_v10 = vld [vmem:[%s289_s2] ss:$0 sm:$0xff]  ;;  %p208_p0 = scmp.ne.s32.totalorder %s144_s6, %s207_s1  ;;  %p213_p2 = scmp.lt.s32.totalorder %s207_s1, %s207_s1 }
   0xd   :  { %p214_p3 = por %p213_p2, %p212_p1 }
   0xe   :  { %180 = vmatpush3.bf16.msra.mxu0 %v201_v4 }
   0xf   :  { %181 = vmatprep.subr.bf16.mxu0 %v229_v1  ;;  %p215_p4 = pnand %p214_p3, %p208_p0 }
  0x12   :  { %182 = vmatpush3.bf16.msra.mxu0 %v202_v5 }
  0x13   :  { %183 = vmatprep.subr.bf16.mxu0 %v229_v1 }
  0x16   :  { %184 = vmatpush3.bf16.msra.mxu0 %v203_v6 }
  0x17   :  { %185 = vmatprep.subr.bf16.mxu0 %v229_v1 }
  0x1a   :  { %186 = vmatpush3.bf16.msra.mxu0 %v204_v7 }
  0x1b   :  { %187 = vmatprep.subr.bf16.mxu0 %v229_v1 }
  0x1e   :  { %188 = vmatpush3.bf16.msra.mxu0 %v205_v8 }
  0x21   :  { %190 = vmatmul.mubr.bf16.vlgmr.msra.gmra.mxu0 %v206_v9 }
  0xe1   :  { %v129_v11 = vpop.f32.mrf.mxu0 }
  0xe2   :  { %v130_v12 = vadd.f32 %v154_v10, %v129_v11 }
  0xe3   :  { %v191_v13 = vpop.f32.mrf.mxu0 }
  0xe4   :  { %136 = vst [vmem:[#allocation2] sm:$0xff] %v130_v12 }
  0xe5   :  { %v132_v14 = vpop.f32.mrf.mxu0 }
  0xe6   :  { %v133_v15 = vadd.f32 %v154_v10, %v132_v14 }
  0xe7   :  { %v192_v16 = vpop.f32.mrf.mxu0 }
  0xe8   :  { %137 = vst [vmem:[#allocation2 + $0x8] sm:$0xff] %v133_v15 }
  0xe9   :  { %218 = shalt.err (!%p215_p4)
}
  0xea   :  { %s232_s0 = smov 128   ;;  %s233_s2 = smov 8  }
  0xeb   :  { %149 = dma.vmem_to_hbm [thread:$0]  %s144_s6, 256, %s290_s3, [#allocation3], %s232_s0, %s232_s0, %s233_s2  }
  0xec   :  { %227 = dma.done.wait [#allocation3], 256  }
  0xed   :  { %228 = vsyncadd [#allocation3], 4294967040 }
  0xee   :  { %153 = vsyncpa [#allocation3], 1 }

// kernel: attention_forward.3
= control target key start
LH: loop header
LB: loop body
LE: loop exit
PB: predicated region body
PF: predicated region fallthrough
CT: control target
= control target key end

     0   :  { %7 = vsyncpa [#allocation3], 0  ;;  %s804_s0 = inlined_call_operand.vmem [shape: bf16[16,128], index: 0, kind: input, shape index: {}]   ;;  %s805_s1 = inlined_call_operand.hbm [shape: bf16[128,384], index: 1, kind: input, shape index: {}]   ;;  %s806_s2 = inlined_call_operand.vmem [shape: bf16[16,384], index: 2, kind: output, shape index: {}]  }
   0x1   :  { %9 = vsyncpa [#allocation3 + $0x1], 0  ;;  %s693_s9 = smov 0   ;;  %s695_s10 = smov 0  }
   0x2   :  { %s697_s11 = smov 0   ;;  %s699_s12 = smov 0  }
   0x3   :  { %s701_s13 = smov 0   ;;  %s703_s14 = smov 0  }
   0x4 LB: > { %s462_s15 = sadd.s32 4294967295, %s670_s14   ;;  %s24_s16 = sadd.s32 1, %s666_s13  ;;  %s670_s14 = sphi %s703_s14, %s15_s14   ;;  %s666_s13 = sphi %s701_s13, %s815_s13   ;;  %s662_s12 = sphi %s699_s12, %s814_s12   ;;  %s658_s11 = sphi %s697_s11, %s813_s11   ;;  %s654_s10 = sphi %s695_s10, %s812_s10   ;;  %s650_s9 = sphi %s693_s9, %s811_s9  }
   0x5   : > { %p25_p0 = scmp.ge.s32.totalorder %s24_s16, 3  ;;  %s60_s17 = sadd.s32 1, %s658_s11 }
   0x6   : > { %p67_p1 = scmp.ne.s32.totalorder %s658_s11, %s654_s10  ;;  %p68_p2 = scmp.eq.s32.totalorder %s670_s14, 0 }
   0x7   : > { %s817_s16 = smov (%p25_p0, %s24_s16), 0  ;;  %p73_p4 = scmp.ne.s32.totalorder %s654_s10, %s650_s9 }
   0x8   : > { %p729_p3 = por %p68_p2, %p67_p1  ;;  %s57_s19 = ssub.s32 %s666_s13, %s817_s16 }
   0x9   : > { %p74_p5 = scmp.eq.s32.totalorder %s462_s15, 0  ;;  %p58_p6 = scmp.eq.s32.totalorder %s57_s19, 0 }
   0xa   : > { %p99_p7 = scmp.eq.s32.totalorder %s462_s15, 2  ;;  %p529_p10 = scmp.lt.s32.totalorder %s670_s14, 3 }
   0xb   : > { %p736_p8 = por %p74_p5, %p73_p4  ;;  %s134_s23 = sand.u32 1, %s658_s11  }
   0xc   : > { %s741_s21 = scalar_select %p58_p6, %s658_s11, %s60_s17  }
   0xd   : > { %p743_p9 = por %p99_p7, %p67_p1  ;;  %s468_s24 = sshll.u32 %s666_s13, 6 }
   0xe   : > { %s467_s25 = sshll.u32 %s134_s23, 6  ;;  %s143_s28 = scalar_lea.hbm %s805_s1, %s468_s24 }
   0xf   : > { %s138_s29 = scalar_lea.vmem [#allocation2], %s467_s25  ;;  %p755_p11 = pnand %p529_p10, %p729_p3 }
  0x10   : > { %s144_s30 = sshll.u32 %s138_s29, 4  ;;  %p469_p12 = scmp.ge.s32.totalorder %s670_s14, 1  ;;  %s145_s30 = int_to_ptr.vmem [resolvable:$true] %s144_s30 }
  0x11   : > { %s135_s4 = scalar_lea.sflag [#allocation3], %s134_s23  ;;  %p594_p13 = pneg %p755_p11 }
  0x12   : > { %s605_s5 = scalar_lea.vmem %s145_s30, 1024  ;;  %s672_s6 = smov [#allocation2]  }
  0x13   : > { %p606_p0 = scmp.ne.s32.totalorder %s145_s30, %s605_s5  ;;  %s610_s7 = sshll.u32 %s672_s6, 4  ;;  %s611_s7 = int_to_ptr.vmem [resolvable:$false] %s610_s7 }
  0x14   : > { %s612_s8 = scalar_lea.vmem %s611_s7, 2048  ;;  %p613_p4 = scmp.lt.s32.totalorder %s145_s30, %s611_s7 }
  0x15   : > { %p608_p1 = pnand %p606_p0, %p594_p13  ;;  %p614_p5 = scmp.lt.s32.totalorder %s612_s8, %s605_s5 }
  0x17   : > { %p609_p2 = pneg %p608_p1  ;;  %p615_p3 = por %p614_p5, %p613_p4 }
  0x19   : > { %p616_p6 = pnand %p615_p3, %p609_p2 }
  0x1b   : > { %619 = shalt.err (!%p616_p6)
}
  0x1c   : > { %s673_s9 = smov 192   ;;  %s674_s15 = smov 64  }
  0x1d   : > { %s675_s17 = smov 4   ;;  %p152_p7 = scmp.lt.s32.totalorder %s670_s14, 4 }
  0x1e   : > { %528 = dma.hbm_to_vmem [thread:$0]  (!%p755_p11), %s143_s28, 1024, %s145_s30, %s135_s4, %s673_s9, %s674_s15, %s675_s17  }
  0x1f   : > { %p153_p10 = pnand %p469_p12, %p152_p7 }
  0x20   : > { %s768_s18 = sand.u32 (!%p153_p10), 1, %s654_s10  }
  0x21   : > { %156 = sbr.rel (%p153_p10) target bundleno = 280 (0x118), region = 28  ;;  %s470_s19 = sshll.u32 (!%p153_p10), %s768_s18, 6 }
  0x22   : > { %s159_s23 = scalar_lea.sflag (!%p153_p10), [#allocation3], %s768_s18  ;;  %s162_s24 = scalar_lea.vmem (!%p153_p10), [#allocation2], %s470_s19 }
  0x26   : > { %645 = dma.done.wait (%p736_p8), %s159_s23, 1024  }
  0x27   : > { %647 = vsyncadd (%p736_p8), %s159_s23, 4294966272  ;;  %v676_v0 = vmov 0.0   ;;  %vm677_vm0 = vmmov 0   ;;  %v583_v1 = vld [vmem:[%s162_s24 + $0x38] sm:$0xff]   ;;  %v584_v2 = vld [vmem:[%s162_s24 + $0x30] sm:$0xff]   ;;  %s471_s26 = sshll.u32 %s768_s18, 3 }
  0x28   : > { %503 = vmatprep.subr.bf16.mxu0 %v676_v0  ;;  %519 = vmatprep.mubr.msk.bf16.mxu0 %vm677_vm0, %v676_v0  ;;  %v585_v3 = vld [vmem:[%s162_s24 + $0x28] sm:$0xff]   ;;  %v586_v4 = vld [vmem:[%s162_s24 + $0x20] sm:$0xff]   ;;  %v587_v5 = vld [vmem:[%s162_s24 + $0x18] sm:$0xff]   ;;  %s186_s27 = scalar_lea.vmem [#allocation4], %s471_s26  ;;  %s484_s28 = sshll.u32 (%p743_p9), %s662_s12, 2 }
  0x29   : > { %504 = vmatpush3.bf16.msra.mxu0 %v583_v1  ;;  %v588_v6 = vld [vmem:[%s162_s24 + $0x10] sm:$0xff]   ;;  %v589_v7 = vld [vmem:[%s162_s24 + $0x8] sm:$0xff]   ;;  %v590_v8 = vld [vmem:[%s162_s24] sm:$0xff]   ;;  %s329_s3 = scalar_lea.vmem (%p743_p9), %s806_s2, %s484_s28 }
  0x2a   : > { %505 = vmatprep.subr.bf16.mxu0 %v676_v0  ;;  %v591_v9 = vld [vmem:[%s804_s0] sm:$0xff]  }
  0x2d   : > { %506 = vmatpush3.bf16.msra.mxu0 %v584_v2 }
  0x2e   : > { %507 = vmatprep.subr.bf16.mxu0 %v676_v0 }
  0x31   : > { %508 = vmatpush3.bf16.msra.mxu0 %v585_v3 }
  0x32   : > { %509 = vmatprep.subr.bf16.mxu0 %v676_v0 }
  0x35   : > { %510 = vmatpush3.bf16.msra.mxu0 %v586_v4 }
  0x36   : > { %511 = vmatprep.subr.bf16.mxu0 %v676_v0 }
  0x39   : > { %512 = vmatpush3.bf16.msra.mxu0 %v587_v5 }
  0x3a   : > { %513 = vmatprep.subr.bf16.mxu0 %v676_v0 }
  0x3d   : > { %514 = vmatpush3.bf16.msra.mxu0 %v588_v6 }
  0x3e   : > { %515 = vmatprep.subr.bf16.mxu0 %v676_v0 }
  0x41   : > { %516 = vmatpush3.bf16.msra.mxu0 %v589_v7 }
  0x42   : > { %517 = vmatprep.subr.bf16.mxu0 %v676_v0 }
  0x45   : > { %518 = vmatpush3.bf16.msra.mxu0 %v590_v8 }
  0x48   : > { %520 = vmatmul.mubr.bf16.vlgmr.msra.gmra.mxu0 %v591_v9 }
 0x108   : > { %v301_v10 = vpop.f32.mrf.mxu0 }
 0x10a   : > { %v521_v11 = vpop.f32.mrf.mxu0 }
 0x10b   : > { %324 = sbr.rel (!%p743_p9) target bundleno = 280 (0x118), region = 36 }
 0x10c   : > { %v304_v12 = vpop.f32.mrf.mxu0 }
 0x10d   : > { %v492_v13 = vpack.c.bf16 %v304_v12, %v301_v10 }
 0x10e   : > { %v522_v14 = vpop.f32.mrf.mxu0 }
 0x10f   : > { %493 = vst [vmem:[%s186_s27] sm:$0xff] %v492_v13  }
 0x116   : > { %v346_v15 = vld [vmem:[%s186_s27] sm:$0xf]  ;;  %v348_v16 = vld [vmem:[%s186_s27 + $0x4] sm:$0xf] }
 0x117   : > { %347 = vst [vmem:[%s329_s3] sm:$0xf] %v346_v15  ;;  %349 = vst [vmem:[%s329_s3 + $0xc] sm:$0xf] %v348_v16 }
 0x118 PF: > { %s15_s14 = sadd.s32 1, %s670_s14   ;;  %s811_s9 = smov %s654_s10 }
 0x119   : > { %p12_p8 = scmp.ge.s32.totalorder %s15_s14, 5   ;;  %s812_s10 = smov %s658_s11 }
 0x11a   : > { %s813_s11 = smov %s741_s21  ;;  %s814_s12 = smov %s666_s13 }
 0x11b   : > { %s815_s13 = smov %s817_s16  ;;  %14 = sbr.rel (!%p12_p8) target bundleno = 4 (0x4), region = 112 }
 0x120   :  { %387 = vsyncpa [#allocation3], 1 }
 0x121   :  { %389 = vsyncpa [#allocation3 + $0x1], 1 }

// kernel: attention_forward.4
= control target key start
LH: loop header
LB: loop body
LE: loop exit
PB: predicated region body
PF: predicated region fallthrough
CT: control target
= control target key end

     0   :  { %s1812_s12 = smov 0   ;;  %s1814_s13 = smov 0   ;;  %s2091_s0 = inlined_call_operand.vmem [shape: bf16[2,8,384], index: 0, kind: input, shape index: {}, may-alias: {0,1,2}]   ;;  %s2092_s1 = inlined_call_operand.vmem [shape: bf16[2,8,384], index: 1, kind: input, shape index: {}, may-alias: {0,1,2}]   ;;  %s2093_s2 = inlined_call_operand.vmem [shape: bf16[2,8,384], index: 2, kind: input, shape index: {}, may-alias: {0,1,2}]   ;;  %s2094_s3 = inlined_call_operand.vmem [shape: bf16[2,8,128], index: 3, kind: output, shape index: {}]  }
   0x1   :  { %s1816_s14 = smov 0  }
   0x2 LB: > { %s32_s15 = sadd.s32 1, %s1777_s13  ;;  %p1612_p0 = scmp.ge.s32.totalorder %s1781_s14, 1  ;;  %s1781_s14 = sphi %s1816_s14, %s13_s14   ;;  %s1777_s13 = sphi %s1814_s13, %s2096_s13   ;;  %s1773_s12 = sphi %s1812_s12, %s2095_s12  }
   0x3   : > { %p34_p1 = scmp.ge.s32.totalorder %s32_s15, 2  ;;  %p198_p2 = scmp.lt.s32.totalorder %s1781_s14, 3 }
   0x5   : > { %s2098_s15 = smov (%p34_p1, %s32_s15), 0  ;;  %p199_p3 = pnand %p1612_p0, %p198_p2 }
   0x6   : > { %p248_p4 = scmp.lt.s32.totalorder (!%p199_p3), %s1773_s12, 1  ;;  %s1783_s23 = smov (!%p199_p3), 96  }
   0x7   : > { %202 = sbr.rel (%p199_p3) target bundleno = 1084 (0x43c), region = 32  ;;  %s1784_s24 = smov (!%p199_p3), 32  }
   0x8   : > { %s1786_s25 = smov (!%p199_p3), 64  }
   0xc   : > { %s2100_s12 = smov (!%p248_p4, %s1773_s12), 1  ;;  %v1785_v4 = vmov 0   ;;  %vm298_vm0 = vcmask 261120   ;;  %v1787_v6 = vmov 0.0   ;;  %vm1788_vm1 = vmmov 0  }
   0xd   : > { %s1833_s16 = smul.u32 12, %s2100_s12  ;;  %1733 = vset.pattern.permute.xlu1 %v1785_v4  ;;  %1734 = vset.pattern.permute.xlu0 %v1785_v4  ;;  %299 = vst.msk [vmem:[#allocation4] sm:$0xff] %vm298_vm0, %v1787_v6  ;;  %300 = vst.msk [vmem:[#allocation4 + $0x8] sm:$0xff] %vm298_vm0, %v1787_v6  ;;  %v1789_v7 = vmov 1983009808   ;;  %v317_v9 = vlaneseq  ;;  %vm289_vm2 = vcmask 7168  }
   0xe   : > { %1651 = vmatprep.subr.bf16.mxu0 %v1787_v6  ;;  %301 = vst.msk [vmem:[#allocation4 + $0x10] sm:$0xff] %vm298_vm0, %v1787_v6  ;;  %302 = vst.msk [vmem:[#allocation4 + $0x18] sm:$0xff] %vm298_vm0, %v1787_v6  ;;  %1657 = vmatprep.subr.bf16.mxu1 %v1787_v6  ;;  %v315_v8 = vunpack.c.l.s4 %v1789_v7  ;;  %v1790_v12 = vmov 1934713408   ;;  %vm964_vm3 = vcmask 64512   ;;  %vm1089_vm4 = vcmask 1043456  }
   0xf   : > { %s1548_s19 = scalar_lea.vmem %s2092_s1, %s1833_s16  ;;  %s256_s22 = scalar_lea.vmem %s2091_s0, %s1833_s16  ;;  %1653 = vmatprep.mubr.msk.bf16.mxu0 %vm1788_vm1, %v1787_v6  ;;  %1659 = vmatprep.mubr.msk.bf16.mxu1 %vm1788_vm1, %v1787_v6  ;;  %v318_v11 = vshrl.u32 %v317_v9, 7  ;;  %v332_v13 = vunpack.c.l.s4 %v1790_v12  ;;  %294 = vst.msk [vmem:[#allocation3] sm:$0xff] %vm289_vm2, %v1787_v6  ;;  %295 = vst.msk [vmem:[#allocation3 + $0x8] sm:$0xff] %vm289_vm2, %v1787_v6  ;;  %vm1471_vm5 = vcmask 523264   ;;  %vm1473_vm6 = vcmask 785408  }
  0x10   : > { %v1617_v0 = vld [vmem:[%s1548_s19 + $0x4] sm:$0xf]  ;;  %v303_v1 = vld [vmem:[%s256_s22] sm:$0xf]  ;;  %v316_v10 = vunpack.c.0.s8 %v315_v8  ;;  %296 = vst.msk [vmem:[#allocation3 + $0x10] sm:$0xff] %vm289_vm2, %v1787_v6  ;;  %297 = vst.msk [vmem:[#allocation3 + $0x18] sm:$0xff] %vm289_vm2, %v1787_v6  ;;  %s1554_s28 = scalar_lea.vmem %s2093_s2, %s1833_s16 }
  0x11   : > { %477 = vrot.lane.b32.xlu0 %v1617_v0, %s1783_s23  ;;  %481 = vrot.lane.b32.xlu1 %v1617_v0, %s1784_s24  ;;  %v304_v2 = vunpack.c.l.bf16 %v303_v1  ;;  %v486_v15 = vshrl.u32 %v1617_v0, 16  ;;  %v333_v20 = vunpack.c.0.s8 %v332_v13  ;;  %s1616_s29 = sshll.u32 %s2100_s12, 2 }
  0x12   : > { %v1865_v18 = vsub.s32 %v316_v10, %v318_v11  ;;  %s283_s5 = scalar_lea.vmem %s2094_s3, %s1616_s29 }
  0x13   : > { %v305_v3 = vmul.f32 0.17677669, %v304_v2  ;;  %v1868_v28 = vsub.s32 %v333_v20, %v318_v11 }
  0x15   : > { %479 = vrot.lane.b32.xlu0 %v1617_v0, %s1786_s25  ;;  %v306_v5 = vpack.c.bf16 %v305_v3, %v305_v3 }
  0x17   : > { %308 = vrot.lane.b32.xlu1 %v306_v5, %s1783_s23  ;;  %v320_v33 = vrot.slane %v306_v5, %v1865_v18 }
  0x19   : > { %310 = vrot.lane.b32.xlu0 %v306_v5, %s1786_s25 }
  0x1b   : > { %312 = vrot.lane.b32.xlu1 %v306_v5, %s1784_s24 }
  0x83   : > { %v478_v14 = vpop.permute.xlu0 %477  ;;  %v482_v16 = vpop.permute.xlu1 %481 }
  0x84   : > { %v487_v17 = vshrl.u32 %v478_v14, 16  ;;  %v485_v19 = vpack.i.b16 %v478_v14, %v1617_v0  ;;  %v493_v23 = vshrl.u32 %v482_v16, 16 }
  0x86   : > { %v488_v21 = vpack.i.b16 %v487_v17, %v486_v15  ;;  %v502_v27 = vrot.slane %v485_v19, %v1865_v18 }
  0x87   : > { %v480_v22 = vpop.permute.xlu0 %479 }
  0x88   : > { %v491_v24 = vpack.i.b16 %v482_v16, %v480_v22  ;;  %v492_v25 = vshrl.u32 %v480_v22, 16  ;;  %v536_v31 = vrot.slane %v488_v21, %v1865_v18 }
  0x89   : > { %v309_v26 = vpop.permute.xlu1 %308 }
  0x8a   : > { %v494_v29 = vpack.i.b16 %v493_v23, %v492_v25  ;;  %v510_v30 = vrot.slane %v491_v24, %v1865_v18  ;;  %v354_v43 = vrot.slane %v309_v26, %v1865_v18 }
  0x8b   : > { %v311_v32 = vpop.permute.xlu0 %310 }
  0x8c   : > { %v511_v34 = vcombine.low %v502_v27, %v510_v30  ;;  %v512_v35 = vcombine.high %v502_v27, %v510_v30  ;;  %v544_v36 = vrot.slane %v494_v29, %v1865_v18  ;;  %v328_v37 = vrot.slane %v311_v32, %v1865_v18 }
  0x8d   : > { %v313_v38 = vpop.permute.xlu1 %312 }
  0x8e   : > { %v519_v39 = vrot.slane %v511_v34, %v1868_v28  ;;  %v526_v40 = vrot.slane %v512_v35, %v1868_v28  ;;  %v545_v41 = vcombine.low %v536_v31, %v544_v36  ;;  %v546_v42 = vcombine.high %v536_v31, %v544_v36 }
  0x8f   : > { %v329_v44 = vcombine.low %v320_v33, %v328_v37  ;;  %v330_v45 = vcombine.high %v320_v33, %v328_v37  ;;  %v362_v46 = vrot.slane %v313_v38, %v1865_v18 }
  0x90   : > { %v553_v47 = vrot.slane %v545_v41, %v1868_v28  ;;  %v560_v48 = vrot.slane %v546_v42, %v1868_v28  ;;  %v563_v49 = vcombine.low %v519_v39, %v526_v40  ;;  %v1618_v50 = vcombine.high %v519_v39, %v526_v40 }
  0x91   : > { %v337_v51 = vrot.slane %v329_v44, %v1868_v28  ;;  %v344_v52 = vrot.slane %v330_v45, %v1868_v28  ;;  %v363_v53 = vcombine.low %v354_v43, %v362_v46  ;;  %v364_v54 = vcombine.high %v354_v43, %v362_v46 }
  0x92   : > { %v588_v55 = vcombine.low %v553_v47, %v560_v48  ;;  %v1619_v56 = vcombine.high %v553_v47, %v560_v48  ;;  %v570_v57 = vrot.slane %v563_v49, %v1865_v18  ;;  %v578_v58 = vrot.slane %v1618_v50, %v1865_v18 }
  0x93   : > { %v345_v59 = vcombine.high %v337_v51, %v1785_v4  ;;  %v346_v60 = vcombine.high %v344_v52, %v1785_v4  ;;  %v385_v61 = vshrl.u32 %v337_v51, 16  ;;  %v371_v62 = vrot.slane %v363_v53, %v1868_v28 }
  0x94   : > { %v378_v63 = vrot.slane %v364_v54, %v1868_v28  ;;  %v579_v0 = vcombine.low %v570_v57, %v578_v58  ;;  %v595_v1 = vrot.slane %v588_v55, %v1865_v18  ;;  %v401_v3 = vshrl.u32 %v344_v52, 16 }
  0x95   : > { %v393_v2 = vshrl.u32 %v345_v59, 16  ;;  %v409_v5 = vshrl.u32 %v346_v60, 16  ;;  %v603_v7 = vrot.slane %v1619_v56, %v1865_v18  ;;  %v379_v8 = vcombine.high %v371_v62, %v1785_v4 }
  0x96   : > { %v380_v9 = vcombine.high %v378_v63, %v1785_v4  ;;  %v383_v10 = vpack.i.b16 %v371_v62, %v337_v51  ;;  %v386_v11 = vshrl.u32 %v371_v62, 16  ;;  %v399_v12 = vpack.i.b16 %v378_v63, %v344_v52 }
  0x97   : > { %v402_v13 = vshrl.u32 %v378_v63, 16  ;;  %v586_v14 = vrot.slane %v579_v0, %v1868_v28  ;;  %v604_v15 = vcombine.low %v595_v1, %v603_v7  ;;  %v391_v17 = vpack.i.b16 %v379_v8, %v345_v59 }
  0x98   : > { %v387_v16 = vpack.i.b16 %v386_v11, %v385_v61  ;;  %v394_v19 = vshrl.u32 %v379_v8, 16  ;;  %v407_v20 = vpack.i.b16 %v380_v9, %v346_v60  ;;  %v410_v22 = vshrl.u32 %v380_v9, 16 }
  0x99   : > { %v403_v21 = vpack.i.b16 %v402_v13, %v401_v3  ;;  %v413_v23 = vcombine.low %v383_v10, %v399_v12  ;;  %v611_v24 = vrot.slane %v604_v15, %v1868_v28  ;;  %v616_v33 = vshrl.u32 %v586_v14, 16 }
  0x9a   : > { %v395_v25 = vpack.i.b16 %v394_v19, %v393_v2  ;;  %v421_v26 = vcombine.low %v391_v17, %v407_v20  ;;  %v411_v27 = vpack.i.b16 %v410_v22, %v409_v5  ;;  %v587_v42 = vcombine.high %v586_v14, %v1785_v4 }
  0x9b   : > { %v438_v29 = vcombine.low %v387_v16, %v403_v21  ;;  %v615_v30 = vpack.i.b16 %v611_v24, %v586_v14  ;;  %v420_v31 = vrot.slane %v413_v23, %v1865_v18  ;;  %v617_v34 = vshrl.u32 %v611_v24, 16  ;;  %v1620_v23 = vld [vmem:[%s1554_s28 + $0x8] sm:$0xf] }
  0x9c   : > { %v428_v32 = vrot.slane %v421_v26, %v1865_v18  ;;  %v446_v35 = vcombine.low %v395_v25, %v411_v27  ;;  %v612_v37 = vcombine.high %v611_v24, %v1785_v4  ;;  %v622_v49 = vshrl.u32 %v587_v42, 16 }
  0x9d   : > { %v780_v36 = vsel %vm298_vm0, %v615_v30, 0  ;;  %v618_v38 = vpack.i.b16 %v617_v34, %v616_v33  ;;  %v445_v40 = vrot.slane %v438_v29, %v1865_v18  ;;  %v1791_v63 = vmov -inf  }
  0x9e   : > { %1652 = vmatpush3.bf16.xpose.msra.mxu0 %v780_v36  ;;  %v429_v39 = vcombine.low %v420_v31, %v428_v32  ;;  %v453_v41 = vrot.slane %v446_v35, %v1865_v18  ;;  %v623_v46 = vshrl.u32 %v612_v37, 16  ;;  %v621_v48 = vpack.i.b16 %v612_v37, %v587_v42  ;;  %290 = vst.msk [vmem:[#allocation2] sm:$0xff] %vm289_vm2, %v1791_v63 }
  0x9f   : > { %1663 = vmatprep.subr.bf16.mxu0 %v1787_v6  ;;  %v826_v43 = vsel %vm298_vm0, %v618_v38, 0  ;;  %291 = vst.msk [vmem:[#allocation2 + $0x8] sm:$0xff] %vm289_vm2, %v1791_v63  ;;  %292 = vst.msk [vmem:[#allocation2 + $0x10] sm:$0xff] %vm289_vm2, %v1791_v63 }
  0xa0   : > { %1658 = vmatpush3.bf16.xpose.msra.mxu1 %v826_v43  ;;  %v436_v44 = vrot.slane %v429_v39, %v1868_v28  ;;  %v454_v45 = vcombine.low %v445_v40, %v453_v41  ;;  %v624_v53 = vpack.i.b16 %v623_v46, %v622_v49  ;;  %v872_v54 = vsel %vm298_vm0, %v621_v48, 0  ;;  %293 = vst.msk [vmem:[#allocation2 + $0x18] sm:$0xff] %vm289_vm2, %v1791_v63 }
  0xa1   : > { %1669 = vmatprep.subr.bf16.mxu1 %v1787_v6  ;;  %v636_v39 = vshrl.u32 %v1620_v23, 16 }
  0xa2   : > { %v461_v47 = vrot.slane %v454_v45, %v1868_v28  ;;  %v466_v51 = vshrl.u32 %v436_v44, 16  ;;  %v918_v57 = vsel %vm298_vm0, %v624_v53, 0  ;;  %v437_v58 = vcombine.high %v436_v44, %v1785_v4 }
  0xa4   : > { %v465_v50 = vpack.i.b16 %v461_v47, %v436_v44  ;;  %v467_v52 = vshrl.u32 %v461_v47, 16  ;;  %v462_v56 = vcombine.high %v461_v47, %v1785_v4  ;;  %v472_v61 = vshrl.u32 %v437_v58, 16 }
  0xa5   : > { %v1960_v24 = vld [vmem:[#allocation2] sm:$0xff] }
  0xa6   : > { %1654 = vmatmul.mubr.msk.bf16.vlgmr.msra.gmra.mxu0 %vm298_vm0, %v465_v50  ;;  %v468_v55 = vpack.i.b16 %v467_v52, %v466_v51  ;;  %v473_v59 = vshrl.u32 %v462_v56, 16  ;;  %v471_v60 = vpack.i.b16 %v462_v56, %v437_v58  ;;  %v1962_v26 = vld [vmem:[#allocation2 + $0x8] sm:$0xff]  ;;  %v1980_v33 = vld [vmem:[#allocation2 + $0x10] sm:$0xff] }
  0xa7   : > { %1664 = vmatpush3.bf16.xpose.msra.mxu0 %v872_v54  ;;  %1665 = vmatprep.mubr.msk.bf16.mxu0 %vm1788_vm1, %v1787_v6  ;;  %v1985_v37 = vld [vmem:[#allocation2 + $0x18] sm:$0xff] }
  0xa8   : > { %1660 = vmatmul.mubr.msk.bf16.vlgmr.msra.gmra.mxu1 %vm298_vm0, %v468_v55  ;;  %1675 = vmatprep.subr.bf16.mxu0 %v1787_v6  ;;  %v474_v62 = vpack.i.b16 %v473_v59, %v472_v61 }
  0xa9   : > { %1670 = vmatpush3.bf16.xpose.msra.mxu1 %v918_v57  ;;  %1671 = vmatprep.mubr.msk.bf16.mxu1 %vm1788_vm1, %v1787_v6 }
  0xaa   : > { %1681 = vmatprep.subr.bf16.mxu1 %v1787_v6 }
  0xae   : > { %1666 = vmatmul.mubr.msk.bf16.vlgmr.msra.gmra.mxu0 %vm298_vm0, %v471_v60 }
  0xaf   : > { %1677 = vmatprep.mubr.msk.bf16.mxu0 %vm1788_vm1, %v1787_v6 }
  0xb0   : > { %1672 = vmatmul.mubr.msk.bf16.vlgmr.msra.gmra.mxu1 %vm298_vm0, %v474_v62 }
  0xb1   : > { %1683 = vmatprep.mubr.msk.bf16.mxu1 %vm1788_vm1, %v1787_v6 }
 0x166   : > { %v1937_v0 = vpop.f32.mrf.mxu0 }
 0x167   : > { %v965_v1 = vsel %vm964_vm3, %v1937_v0, -inf }
 0x168   : > { %v1941_v2 = vpop.f32.mrf.mxu1  ;;  %966 = vmax.xlane.f32.xlu0 %v965_v1  ;;  %v1655_v3 = vpop.f32.mrf.mxu0 }
 0x169   : > { %v968_v5 = vsel %vm964_vm3, %v1941_v2, -inf }
 0x16a   : > { %969 = vmax.xlane.f32.xlu1 %v968_v5  ;;  %v819_v7 = vpop.f32.mrf.mxu0  ;;  %v1661_v8 = vpop.f32.mrf.mxu1 }
 0x16c   : > { %v1656_v9 = vpop.f32.mrf.mxu0  ;;  %v865_v10 = vpop.f32.mrf.mxu1 }
 0x16e   : > { %v1662_v11 = vpop.f32.mrf.mxu1  ;;  %v1945_v12 = vpop.f32.mrf.mxu0 }
 0x16f   : > { %v971_v13 = vsel %vm964_vm3, %v1945_v12, -inf }
 0x170   : > { %v1949_v14 = vpop.f32.mrf.mxu1  ;;  %972 = vmax.xlane.f32.xlu0 %v971_v13  ;;  %v1667_v15 = vpop.f32.mrf.mxu0 }
 0x171   : > { %v974_v19 = vsel %vm964_vm3, %v1949_v14, -inf }
 0x172   : > { %v911_v16 = vpop.f32.mrf.mxu0  ;;  %v1673_v17 = vpop.f32.mrf.mxu1 }
 0x174   : > { %v957_v20 = vpop.f32.mrf.mxu1  ;;  %975 = vmax.xlane.f32.xlu0 %v974_v19  ;;  %v1668_v21 = vpop.f32.mrf.mxu0 }
 0x176   : > { %v1674_v22 = vpop.f32.mrf.mxu1 }
 0x17b   : > { %627 = vrot.lane.b32.xlu1 %v1620_v23, %s1783_s23 }
 0x17f   : > { %631 = vrot.lane.b32.xlu1 %v1620_v23, %s1784_s24 }
 0x18a   : > { %629 = vrot.lane.b32.xlu0 %v1620_v23, %s1786_s25 }
 0x1f1   : > { %v967_v25 = vpop.xlane.xlu0 %966 }
 0x1f2   : > { %v1965_v27 = vmax.f32 %v1960_v24, %v967_v25 }
 0x1f3   : > { %v970_v29 = vpop.xlane.xlu1 %969 }
 0x1f4   : > { %v981_v30 = vsub.f32 %v1960_v24, %v1965_v27  ;;  %1279 = vst.msk [vmem:[#allocation2] sm:$0xff] %vm289_vm2, %v1965_v27  ;;  %v1972_v31 = vmax.f32 %v1962_v26, %v970_v29  ;;  %995 = vperm.xlu1 %1733, %v1965_v27  }
 0x1f6   : > { %v982_v32 = vsub.f32 %v1962_v26, %v1972_v31  ;;  %1280 = vst.msk [vmem:[#allocation2 + $0x8] sm:$0xff] %vm289_vm2, %v1972_v31  ;;  %1000 = vperm.xlu0 %1734, %v1972_v31   ;;  %v1027_v31 = vld [vmem:[#allocation3 + $0x10] sm:$0xff] }
 0x1f7   : > { %v628_v34 = vpop.permute.xlu1 %627 }
 0x1f8   : > { %v637_v40 = vshrl.u32 %v628_v34, 16  ;;  %v635_v44 = vpack.i.b16 %v628_v34, %v1620_v23 }
 0x1f9   : > { %v973_v35 = vpop.xlane.xlu0 %972 }
 0x1fa   : > { %v1983_v36 = vmax.f32 %v1980_v33, %v973_v35  ;;  %v638_v46 = vpack.i.b16 %v637_v40, %v636_v39  ;;  %v652_v49 = vrot.slane %v635_v44, %v1865_v18 }
 0x1fb   : > { %v632_v42 = vpop.permute.xlu1 %631 }
 0x1fc   : > { %v983_v38 = vsub.f32 %v1980_v33, %v1983_v36  ;;  %1281 = vst.msk [vmem:[#allocation2 + $0x10] sm:$0xff] %vm289_vm2, %v1983_v36  ;;  %1005 = vperm.xlu1 %1733, %v1983_v36   ;;  %v643_v47 = vshrl.u32 %v632_v42, 16  ;;  %v686_v52 = vrot.slane %v638_v46, %v1865_v18  ;;  %v987_v33 = vmul.f32 1.442695, %v982_v32 }
 0x1fd   : > { %v976_v41 = vpop.xlane.xlu0 %975 }
 0x1fe   : > { %v1993_v43 = vmax.f32 %v1985_v37, %v976_v41 }
 0x200   : > { %v984_v45 = vsub.f32 %v1985_v37, %v1993_v43  ;;  %1282 = vst.msk [vmem:[#allocation2 + $0x18] sm:$0xff] %vm289_vm2, %v1993_v43  ;;  %1010 = vperm.xlu1 %1733, %v1993_v43  }
 0x201   : > { %v630_v48 = vpop.permute.xlu0 %629 }
 0x202   : > { %v641_v50 = vpack.i.b16 %v632_v42, %v630_v48  ;;  %v642_v51 = vshrl.u32 %v630_v48, 16 }
 0x204   : > { %v644_v53 = vpack.i.b16 %v643_v47, %v642_v51  ;;  %v660_v54 = vrot.slane %v641_v50, %v1865_v18 }
 0x206   : > { %v661_v55 = vcombine.low %v652_v49, %v660_v54  ;;  %v662_v56 = vcombine.high %v652_v49, %v660_v54  ;;  %v694_v57 = vrot.slane %v644_v53, %v1865_v18 }
 0x208   : > { %v669_v58 = vrot.slane %v661_v55, %v1868_v28  ;;  %v676_v59 = vrot.slane %v662_v56, %v1868_v28  ;;  %v695_v60 = vcombine.low %v686_v52, %v694_v57  ;;  %v696_v61 = vcombine.high %v686_v52, %v694_v57 }
 0x20a   : > { %v703_v62 = vrot.slane %v695_v60, %v1868_v28  ;;  %v710_v63 = vrot.slane %v696_v61, %v1868_v28  ;;  %v713_v1 = vcombine.low %v669_v58, %v676_v59  ;;  %v1621_v3 = vcombine.high %v669_v58, %v676_v59 }
 0x20b   : > { %v991_v61 = vmul.f32 1.442695, %v984_v45  ;;  %v1025_v45 = vld [vmem:[#allocation3] sm:$0xff] }
 0x20c   : > { %v720_v5 = vrot.slane %v713_v1, %v1865_v18  ;;  %v728_v7 = vrot.slane %v1621_v3, %v1865_v18  ;;  %v738_v8 = vcombine.low %v703_v62, %v710_v63  ;;  %v1622_v9 = vcombine.high %v703_v62, %v710_v63  ;;  %v1026_v1 = vld [vmem:[#allocation3 + $0x8] sm:$0xff] }
 0x20e   : > { %v745_v10 = vrot.slane %v738_v8, %v1865_v18  ;;  %v753_v11 = vrot.slane %v1622_v9, %v1865_v18  ;;  %v729_v13 = vcombine.low %v720_v5, %v728_v7 }
 0x210   : > { %v736_v15 = vrot.slane %v729_v13, %v1868_v28  ;;  %v754_v16 = vcombine.low %v745_v10, %v753_v11  ;;  %v1028_v11 = vld [vmem:[#allocation3 + $0x18] sm:$0xff] }
 0x212   : > { %v761_v17 = vrot.slane %v754_v16, %v1868_v28  ;;  %v766_v19 = vshrl.u32 %v736_v15, 16  ;;  %v737_v20 = vcombine.high %v736_v15, %v1785_v4 }
 0x214   : > { %v765_v21 = vpack.i.b16 %v761_v17, %v736_v15  ;;  %v767_v22 = vshrl.u32 %v761_v17, 16  ;;  %v762_v23 = vcombine.high %v761_v17, %v1785_v4  ;;  %v772_v25 = vshrl.u32 %v737_v20, 16 }
 0x216   : > { %v1091_v29 = vsel %vm1089_vm4, %v765_v21, 0  ;;  %v768_v34 = vpack.i.b16 %v767_v22, %v766_v19  ;;  %v771_v35 = vpack.i.b16 %v762_v23, %v737_v20  ;;  %v773_v39 = vshrl.u32 %v762_v23, 16 }
 0x217   : > { %1676 = vmatpush3.bf16.msra.mxu0 %v1091_v29 }
 0x218   : > { %v1137_v40 = vsel %vm1089_vm4, %v768_v34, 0  ;;  %1687 = vmatprep.subr.bf16.mxu0 %v1787_v6  ;;  %v1183_v41 = vsel %vm1089_vm4, %v771_v35, 0  ;;  %v774_v42 = vpack.i.b16 %v773_v39, %v772_v25  ;;  %v1054_v39 = vld [vmem:[#allocation4] sm:$0xff] }
 0x219   : > { %1682 = vmatpush3.bf16.msra.mxu1 %v1137_v40  ;;  %v1055_v40 = vld [vmem:[#allocation4 + $0x8] sm:$0xff] }
 0x21a   : > { %1693 = vmatprep.subr.bf16.mxu1 %v1787_v6  ;;  %v1229_v44 = vsel %vm1089_vm4, %v774_v42, 0 }
 0x26f   : > { %v996_v4 = vpop.permute.xlu1 %995 }
 0x270   : > { %v1013_v46 = vsub.f32 %v1937_v0, %v996_v4 }
 0x271   : > { %v1001_v47 = vpop.permute.xlu0 %1000 }
 0x272   : > { %v1017_v48 = vmul.f32 1.442695, %v1013_v46  ;;  %v1014_v49 = vsub.f32 %v1941_v2, %v1001_v47  ;;  %v985_v2 = vmul.f32 1.442695, %v981_v30 }
 0x274   : > { %1735 = vpow2.f32 %v1017_v48  ;;  %v1019_v50 = vmul.f32 1.442695, %v1014_v49 }
 0x276   : > { %1737 = vpow2.f32 %v1019_v50 }
 0x277   : > { %v1006_v51 = vpop.permute.xlu1 %1005 }
 0x278   : > { %v1015_v52 = vsub.f32 %v1945_v12, %v1006_v51  ;;  %v1056_v51 = vld [vmem:[#allocation4 + $0x10] sm:$0xff] }
 0x27a   : > { %v1021_v53 = vmul.f32 1.442695, %v1015_v52 }
 0x27b   : > { %v1011_v54 = vpop.permute.xlu1 %1010 }
 0x27c   : > { %1739 = vpow2.f32 %v1021_v53  ;;  %v1016_v55 = vsub.f32 %v1949_v14, %v1011_v54  ;;  %v989_v14 = vmul.f32 1.442695, %v983_v38 }
 0x27e   : > { %v1023_v56 = vmul.f32 1.442695, %v1016_v55 }
 0x280   : > { %1741 = vpow2.f32 %v1023_v56 }
 0x281   : > { %v1736_v57 = vpop.eup %1735  ;;  %1743 = vpow2.f32 %v985_v2 }
 0x282   : > { %v1033_v0 = vsel %vm964_vm3, %v1736_v57, 0.0  ;;  %v1082_v58 = vpack.c.bf16 %v1736_v57, %v1736_v57  ;;  %1745 = vpow2.f32 %v989_v14 }
 0x283   : > { %v1738_v59 = vpop.eup %1737  ;;  %1034 = vadd.xlane.f32.xlu0 %v1033_v0  ;;  %1747 = vpow2.f32 %v991_v61  ;;  %v1057_v0 = vld [vmem:[#allocation4 + $0x18] sm:$0xff] }
 0x284   : > { %1678 = vmatmul.mubr.msk.bf16.vlgmr.msra.gmra.mxu0 %vm964_vm3, %v1082_v58  ;;  %v1036_v12 = vsel %vm964_vm3, %v1738_v59, 0.0  ;;  %v1083_v60 = vpack.c.bf16 %v1738_v59, %v1738_v59  ;;  %1749 = vpow2.f32 %v987_v33 }
 0x285   : > { %1688 = vmatpush3.bf16.msra.mxu0 %v1183_v41  ;;  %1037 = vadd.xlane.f32.xlu1 %v1036_v12 }
 0x286   : > { %1684 = vmatmul.mubr.msk.bf16.vlgmr.msra.gmra.mxu1 %vm964_vm3, %v1083_v60  ;;  %1689 = vmatprep.mubr.msk.bf16.mxu0 %vm1788_vm1, %v1787_v6 }
 0x287   : > { %1694 = vmatpush3.bf16.msra.mxu1 %v1229_v44  ;;  %1695 = vmatprep.mubr.msk.bf16.mxu1 %vm1788_vm1, %v1787_v6 }
 0x289   : > { %v1740_v24 = vpop.eup %1739 }
 0x28a   : > { %v1039_v27 = vsel %vm964_vm3, %v1740_v24, 0.0  ;;  %v1084_v30 = vpack.c.bf16 %v1740_v24, %v1740_v24 }
 0x28b   : > { %1040 = vadd.xlane.f32.xlu0 %v1039_v27 }
 0x28c   : > { %1690 = vmatmul.mubr.msk.bf16.vlgmr.msra.gmra.mxu0 %vm964_vm3, %v1084_v30 }
 0x28d   : > { %v1742_v62 = vpop.eup %1741 }
 0x28e   : > { %v1042_v6 = vsel %vm964_vm3, %v1742_v62, 0.0  ;;  %v1085_v63 = vpack.c.bf16 %v1742_v62, %v1742_v62  ;;  %v1744_v36 = vpop.eup %1743 }
 0x28f   : > { %1043 = vadd.xlane.f32.xlu0 %v1042_v6  ;;  %v1746_v38 = vpop.eup %1745  ;;  %v1029_v3 = vmul.f32 %v1744_v36, %v1025_v45 }
 0x290   : > { %1696 = vmatmul.mubr.msk.bf16.vlgmr.msra.gmra.mxu1 %vm964_vm3, %v1085_v63  ;;  %v1748_v37 = vpop.eup %1747  ;;  %v1031_v32 = vmul.f32 %v1746_v38, %v1027_v31 }
 0x291   : > { %v1750_v43 = vpop.eup %1749  ;;  %v1032_v16 = vmul.f32 %v1748_v37, %v1028_v11 }
 0x292   : > { %v1030_v8 = vmul.f32 %v1750_v43, %v1026_v1 }
 0x296   : > { %1060 = vperm.xlu1 %1733, %v1744_v36  }
 0x29a   : > { %1070 = vperm.xlu1 %1733, %v1746_v38  }
 0x29e   : > { %1075 = vperm.xlu1 %1733, %v1748_v37  }
 0x2a5   : > { %1065 = vperm.xlu0 %1734, %v1750_v43  }
 0x30c   : > { %v1035_v5 = vpop.xlane.xlu0 %1034 }
 0x30d   : > { %v1045_v7 = vadd.f32 %v1035_v5, %v1029_v3 }
 0x30e   : > { %v1038_v9 = vpop.xlane.xlu1 %1037 }
 0x30f   : > { %1050 = vst.msk [vmem:[#allocation3] sm:$0xff] %vm289_vm2, %v1045_v7  ;;  %v1046_v26 = vadd.f32 %v1038_v9, %v1030_v8 }
 0x311   : > { %1051 = vst.msk [vmem:[#allocation3 + $0x8] sm:$0xff] %vm289_vm2, %v1046_v26 }
 0x312   : > { %v1061_v35 = vpop.permute.xlu1 %1060 }
 0x313   : > { %v1078_v42 = vmul.f32 %v1061_v35, %v1054_v39 }
 0x314   : > { %v1041_v10 = vpop.xlane.xlu0 %1040 }
 0x315   : > { %v1047_v13 = vadd.f32 %v1041_v10, %v1031_v32 }
 0x316   : > { %v1286_v15 = vld [vmem:[#allocation3] sm:$0xff]  ;;  %v1071_v4 = vpop.permute.xlu1 %1070 }
 0x317   : > { %1052 = vst.msk [vmem:[#allocation3 + $0x10] sm:$0xff] %vm289_vm2, %v1047_v13  ;;  %1751 = vrcp.f32 %v1286_v15  ;;  %v1080_v56 = vmul.f32 %v1071_v4, %v1056_v51 }
 0x318   : > { %v1044_v17 = vpop.xlane.xlu0 %1043  ;;  %v1287_v19 = vld [vmem:[#allocation3 + $0x8] sm:$0xff] }
 0x319   : > { %v1048_v20 = vadd.f32 %v1044_v17, %v1032_v16  ;;  %1753 = vrcp.f32 %v1287_v19 }
 0x31a   : > { %v1076_v57 = vpop.permute.xlu1 %1075 }
 0x31b   : > { %1053 = vst.msk [vmem:[#allocation3 + $0x18] sm:$0xff] %vm289_vm2, %v1048_v20  ;;  %v1081_v60 = vmul.f32 %v1076_v57, %v1057_v0 }
 0x31e   : > { %v1288_v21 = vld [vmem:[#allocation3 + $0x10] sm:$0xff] }
 0x31f   : > { %1755 = vrcp.f32 %v1288_v21 }
 0x320   : > { %v1066_v41 = vpop.permute.xlu0 %1065 }
 0x321   : > { %v1079_v46 = vmul.f32 %v1066_v41, %v1055_v40 }
 0x322   : > { %v1289_v22 = vld [vmem:[#allocation3 + $0x18] sm:$0xff] }
 0x323   : > { %1757 = vrcp.f32 %v1289_v22 }
 0x324   : > { %v1752_v23 = vpop.eup %1751 }
 0x325   : > { %1300 = vperm.xlu0 %1734, %v1752_v23  }
 0x326   : > { %v1754_v25 = vpop.eup %1753 }
 0x327   : > { %1305 = vperm.xlu1 %1733, %v1754_v25  }
 0x32c   : > { %v1756_v29 = vpop.eup %1755 }
 0x32d   : > { %1310 = vperm.xlu0 %1734, %v1756_v29  }
 0x330   : > { %v1758_v34 = vpop.eup %1757 }
 0x331   : > { %1315 = vperm.xlu1 %1733, %v1758_v34  }
 0x344   : > { %v1127_v44 = vpop.f32.mrf.mxu0 }
 0x345   : > { %v1271_v47 = vadd.f32 %v1127_v44, %v1078_v42 }
 0x346   : > { %v1679_v48 = vpop.f32.mrf.mxu0  ;;  %v1173_v49 = vpop.f32.mrf.mxu1 }
 0x347   : > { %1275 = vst.msk [vmem:[#allocation4] sm:$0xff] %vm298_vm0, %v1271_v47  ;;  %v1272_v50 = vadd.f32 %v1173_v49, %v1079_v46 }
 0x348   : > { %v1130_v52 = vpop.f32.mrf.mxu0  ;;  %v1685_v53 = vpop.f32.mrf.mxu1 }
 0x349   : > { %1276 = vst.msk [vmem:[#allocation4 + $0x8] sm:$0xff] %vm298_vm0, %v1272_v50 }
 0x34a   : > { %v1680_v54 = vpop.f32.mrf.mxu0  ;;  %v1176_v55 = vpop.f32.mrf.mxu1 }
 0x34c   : > { %v1686_v58 = vpop.f32.mrf.mxu1  ;;  %v1219_v59 = vpop.f32.mrf.mxu0 }
 0x34d   : > { %v1273_v2 = vadd.f32 %v1219_v59, %v1080_v56 }
 0x34e   : > { %v1691_v12 = vpop.f32.mrf.mxu0  ;;  %v1294_v43 = vld [vmem:[#allocation4] sm:$0xff] }
 0x34f   : > { %1277 = vst.msk [vmem:[#allocation4 + $0x10] sm:$0xff] %vm298_vm0, %v1273_v2 }
 0x350   : > { %v1222_v14 = vpop.f32.mrf.mxu0  ;;  %v1265_v24 = vpop.f32.mrf.mxu1  ;;  %v1295_v1 = vld [vmem:[#allocation4 + $0x8] sm:$0xff] }
 0x351   : > { %v1274_v27 = vadd.f32 %v1265_v24, %v1081_v60 }
 0x352   : > { %v1692_v30 = vpop.f32.mrf.mxu0  ;;  %v1697_v61 = vpop.f32.mrf.mxu1 }
 0x353   : > { %1278 = vst.msk [vmem:[#allocation4 + $0x18] sm:$0xff] %vm298_vm0, %v1274_v27 }
 0x354   : > { %v1268_v62 = vpop.f32.mrf.mxu1 }
 0x356   : > { %v1698_v6 = vpop.f32.mrf.mxu1  ;;  %v1296_v38 = vld [vmem:[#allocation4 + $0x10] sm:$0xff] }
 0x35a   : > { %v1297_v3 = vld [vmem:[#allocation4 + $0x18] sm:$0xff] }
 0x3a0   : > { %v1301_v63 = vpop.permute.xlu0 %1300 }
 0x3a1   : > { %v1318_v45 = vmul.f32 %v1301_v63, %v1294_v43 }
 0x3a2   : > { %v1306_v33 = vpop.permute.xlu1 %1305 }
 0x3a3   : > { %v1319_v7 = vmul.f32 %v1306_v33, %v1295_v1 }
 0x3a8   : > { %v1311_v36 = vpop.permute.xlu0 %1310 }
 0x3a9   : > { %v1320_v37 = vmul.f32 %v1311_v36, %v1296_v38 }
 0x3ab   : > { %v1322_v8 = vcombine.low %v1318_v45, %v1320_v37  ;;  %v1323_v9 = vcombine.high %v1318_v45, %v1320_v37 }
 0x3ac   : > { %v1316_v5 = vpop.permute.xlu1 %1315 }
 0x3ad   : > { %v1321_v26 = vmul.f32 %v1316_v5, %v1297_v3  ;;  %v1330_v10 = vrot.slane %v1322_v8, %v1865_v18  ;;  %v1337_v11 = vrot.slane %v1323_v9, %v1865_v18 }
 0x3af   : > { %v1338_v31 = vcombine.low %v1319_v7, %v1321_v26  ;;  %v1339_v32 = vcombine.high %v1319_v7, %v1321_v26 }
 0x3b1   : > { %v1346_v13 = vrot.slane %v1338_v31, %v1865_v18  ;;  %v1353_v15 = vrot.slane %v1339_v32, %v1865_v18 }
 0x3b3   : > { %v1354_v16 = vcombine.low %v1330_v10, %v1346_v13  ;;  %v1355_v17 = vcombine.high %v1330_v10, %v1346_v13  ;;  %v1370_v19 = vcombine.low %v1337_v11, %v1353_v15  ;;  %v1371_v20 = vcombine.high %v1337_v11, %v1353_v15 }
 0x3b5   : > { %v1362_v21 = vrot.slane %v1354_v16, %v1868_v28  ;;  %v1369_v22 = vrot.slane %v1355_v17, %v1868_v28  ;;  %v1378_v23 = vrot.slane %v1370_v19, %v1868_v28  ;;  %v1385_v25 = vrot.slane %v1371_v20, %v1868_v28 }
 0x3b7   : > { %v1390_v29 = vcombine.low %v1362_v21, %v1369_v22  ;;  %v1631_v34 = vcombine.high %v1362_v21, %v1369_v22  ;;  %v1406_v35 = vcombine.low %v1378_v23, %v1385_v25  ;;  %v1632_v39 = vcombine.high %v1378_v23, %v1385_v25 }
 0x3b9   : > { %v1397_v40 = vrot.slane %v1390_v29, %v1865_v18  ;;  %v1405_v41 = vrot.slane %v1631_v34, %v1865_v18  ;;  %v1413_v42 = vrot.slane %v1406_v35, %v1865_v18  ;;  %v1421_v44 = vrot.slane %v1632_v39, %v1865_v18 }
 0x3bb   : > { %v1423_v4 = vcombine.high %v1397_v40, %v1405_v41  ;;  %v1439_v46 = vcombine.high %v1413_v42, %v1421_v44  ;;  %v1422_v47 = vcombine.low %v1397_v40, %v1405_v41  ;;  %v1438_v48 = vcombine.low %v1413_v42, %v1421_v44 }
 0x3bd   : > { %v1437_v49 = vrot.slane %v1423_v4, %v1868_v28  ;;  %v1453_v50 = vrot.slane %v1439_v46, %v1868_v28  ;;  %v1430_v51 = vrot.slane %v1422_v47, %v1868_v28  ;;  %v1446_v52 = vrot.slane %v1438_v48, %v1868_v28 }
 0x3bf   : > { %v1456_v53 = vcombine.low %v1437_v49, %v1453_v50  ;;  %v1455_v54 = vcombine.high %v1430_v51, %v1446_v52  ;;  %v1454_v55 = vcombine.low %v1430_v51, %v1446_v52  ;;  %v1457_v18 = vcombine.high %v1437_v49, %v1453_v50 }
 0x3c1   : > { %1463 = vrot.lane.b32.xlu1 %v1456_v53, %s1786_s25  ;;  %1459 = vrot.lane.b32.xlu0 %v1455_v54, %s1784_s24 }
 0x3c5   : > { %1467 = vrot.lane.b32.xlu0 %v1457_v18, %s1783_s23 }
 0x433   : > { %v1460_v56 = vpop.permute.xlu0 %1459  ;;  %v1464_v57 = vpop.permute.xlu1 %1463 }
 0x434   : > { %v1470_v0 = vsel %vm298_vm0, %v1454_v55, %v1460_v56 }
 0x435   : > { %v1472_v59 = vsel %vm1471_vm5, %v1470_v0, %v1464_v57 }
 0x437   : > { %v1468_v58 = vpop.permute.xlu0 %1467 }
 0x438   : > { %v1474_v28 = vsel %vm1473_vm6, %v1472_v59, %v1468_v58 }
 0x439   : > { %v1475_v2 = vpack.c.bf16 %v1474_v28, %v1474_v28 }
 0x43b   : > { %1476 = vst [vmem:[%s283_s5] sm:$0xf] %v1475_v2 }
 0x43c PF: > { %s13_s14 = sadd.s32 1, %s1781_s14   ;;  %s2095_s12 = smov %s1777_s13 }
 0x43d   : > { %p10_p5 = scmp.ge.s32.totalorder %s13_s14, 4   ;;  %s2096_s13 = smov %s2098_s15 }
 0x43f   :  { %12 = sbr.rel (!%p10_p5) target bundleno = 2 (0x2), region = 76 }

</bundles_post_ra>
